<compile_context>
chip_gen: v7x
topology: tpu7x:2x2x1
jax: 0.10.0
libtpu: 0.0.40
codegen_flags: <defaults>
</compile_context>

<pallas_src>
import functools

import numpy as np
import jax
import jax.numpy as jnp
from jax.experimental import pallas as pl
from jax.experimental.pallas import tpu as pltpu

LSIZE_FLAT = 2 * 2 * 256          # 1024
HIDDEN = 512
_TT = 8                           # timesteps per grid step in the sequence kernel
_TM = 128                         # rows per grid step in the projection kernel
_VMEM_LIMIT = 32 << 20            # explicit, safe on v5e/v6e/v7x (footprint ~4 MiB)


def _round_up(x, m):
    return (x + m - 1) // m * m


# ----------------------------------------------------------------------------
# Deterministic parameter init (mirrors init_W; SVD done on host with numpy).
# Note: the original torch code does an ELEMENTWISE product `u * s_ * v.t()`
# (not a matmul) — we reproduce that semantics exactly.
# ----------------------------------------------------------------------------
def init_W_np(n, m, seed=0):
    rng = np.random.default_rng(seed)
    weight = rng.normal(0.0, 1.0, size=(n, m)).astype(np.float64)
    N = n * m
    p = int(0.2 * N)
    u, s, vh = np.linalg.svd(weight, full_matrices=False)   # vh == torch v.t()
    s_ = 0.95 * s / s.max()
    weight = u * s_ * vh                                     # elementwise, as in torch
    indices = rng.integers(0, N, size=(p,))
    a = indices // n
    b = indices - a * n
    weight[a, b] = 0.0
    return weight.astype(np.float32)                         # (n, m) == (out, in)


def init_W_in_np(out_f, in_f, seed=1):
    rng = np.random.default_rng(seed)
    # Deterministic stand-in for nn.Linear's default init (torch RNG not bit-matched).
    bound = 1.0 / np.sqrt(in_f)
    return rng.uniform(-bound, bound, size=(out_f, in_f)).astype(np.float32)


# ----------------------------------------------------------------------------
# Kernels
# ----------------------------------------------------------------------------
def proj_kernel(x_ref, wint_ref, u_ref):
    # Hoisted, time-independent input projection: U = X @ W_in^T as one big
    # M = Tp*Bp matmul. Grid axis is "parallel" -> shards across v7x's 2 TCs.
    u_ref[...] = jnp.dot(x_ref[...], wint_ref[...],
                         preferred_element_type=jnp.float32)


def esn_fresh_kernel(x_ref, wint_ref, out_ref):
    # First call (no ESN state): x_esn = tanh(W_in x). No recurrent matmul, no blend.
    out_ref[...] = jnp.tanh(
        jnp.dot(x_ref[...], wint_ref[...], preferred_element_type=jnp.float32))


def esn_step_kernel(x_ref, wint_ref, wt_ref, prev_ref, out_ref, *, alpha):
    # Single stateful step. Two accumulating dots, no VMEM staging buffer: the
    # x-projection does not depend on the recurrent state so it can overlap with
    # the state load; the recurrent dot is f32 (no state re-quantization).
    prev = prev_ref[...]                                              # (Bp, 512) f32
    u = jnp.dot(x_ref[...], wint_ref[...], preferred_element_type=jnp.float32)
    r = jnp.dot(prev, wt_ref[...], preferred_element_type=jnp.float32)
    x_hat = jnp.tanh(u + r)
    out_ref[...] = prev + alpha * (x_hat - prev)                      # leaky blend


def esn_seq_kernel(u_ref, wt_ref, prev0_ref, out_ref, state_ref,
                   *, alpha, fresh_start, tt):
    # Time-blocked recurrence: grid step g covers timesteps [g*tt, (g+1)*tt).
    # Only the small K=512 recurrent matmul is serial; W^T and the ESN state are
    # VMEM-resident across the whole sequence; u_t blocks are streamed.
    g = pl.program_id(0)

    @pl.when(g == 0)
    def _():
        state_ref[...] = prev0_ref[...]

    prev = state_ref[...]                                             # (Bp, 512) f32
    wt = wt_ref[...]                                                  # (512, 512) f32
    for step in range(tt):                                            # static unroll
        r = jnp.dot(prev, wt, preferred_element_type=jnp.float32)
        x_hat = jnp.tanh(u_ref[step] + r)
        if fresh_start and step == 0:
            # only the very first timestep of a fresh rollout uses alpha = 1
            a = jnp.where(g == 0, jnp.float32(1.0), jnp.float32(alpha))
        else:
            a = jnp.float32(alpha)
        prev = prev + a * (x_hat - prev)
        out_ref[step] = prev
    state_ref[...] = prev


# ----------------------------------------------------------------------------
# pallas_call builders
# ----------------------------------------------------------------------------
def _build_proj_call(Mp, tm):
    return pl.pallas_call(
        proj_kernel,
        out_shape=jax.ShapeDtypeStruct((Mp, HIDDEN), jnp.float32),
        grid_spec=pltpu.PrefetchScalarGridSpec(
            num_scalar_prefetch=0,
            grid=(Mp // tm,),
            in_specs=[
                pl.BlockSpec((tm, LSIZE_FLAT), lambda m: (m, 0)),      # X rows
                pl.BlockSpec((LSIZE_FLAT, HIDDEN), lambda m: (0, 0)),  # W_in^T
            ],
            out_specs=pl.BlockSpec((tm, HIDDEN), lambda m: (m, 0)),
        ),
        compiler_params=pltpu.CompilerParams(
            dimension_semantics=("parallel",),       # shardable across TCs (v7x)
            vmem_limit_bytes=_VMEM_LIMIT,
        ),
    )


def _build_fresh_call(Bp):
    return pl.pallas_call(
        esn_fresh_kernel,
        out_shape=jax.ShapeDtypeStruct((Bp, HIDDEN), jnp.float32),
        in_specs=[
            pl.BlockSpec(memory_space=pltpu.MemorySpace.VMEM),   # x_pad  (Bp,1024) bf16
            pl.BlockSpec(memory_space=pltpu.MemorySpace.VMEM),   # W_in^T (1024,512) bf16
        ],
        out_specs=pl.BlockSpec(memory_space=pltpu.MemorySpace.VMEM),
        compiler_params=pltpu.CompilerParams(vmem_limit_bytes=_VMEM_LIMIT),
    )


def _build_step_call(Bp, alpha):
    kern = functools.partial(esn_step_kernel, alpha=float(alpha))
    return pl.pallas_call(
        kern,
        out_shape=jax.ShapeDtypeStruct((Bp, HIDDEN), jnp.float32),
        in_specs=[
            pl.BlockSpec(memory_space=pltpu.MemorySpace.VMEM),   # x_pad  (Bp,1024) bf16
            pl.BlockSpec(memory_space=pltpu.MemorySpace.VMEM),   # W_in^T (1024,512) bf16
            pl.BlockSpec(memory_space=pltpu.MemorySpace.VMEM),   # W^T    (512,512)  f32
            pl.BlockSpec(memory_space=pltpu.MemorySpace.VMEM),   # prev   (Bp,512)   f32
        ],
        out_specs=pl.BlockSpec(memory_space=pltpu.MemorySpace.VMEM),
        compiler_params=pltpu.CompilerParams(vmem_limit_bytes=_VMEM_LIMIT),
    )


def _build_seq_call(Tp, Bp, alpha, fresh_start, tt):
    kern = functools.partial(esn_seq_kernel, alpha=float(alpha),
                             fresh_start=bool(fresh_start), tt=int(tt))
    return pl.pallas_call(
        kern,
        out_shape=jax.ShapeDtypeStruct((Tp, Bp, HIDDEN), jnp.float32),
        grid_spec=pltpu.PrefetchScalarGridSpec(
            num_scalar_prefetch=0,
            grid=(Tp // tt,),
            in_specs=[
                # u_t stream: one (TT, Bp, 512) slab per grid step
                pl.BlockSpec((tt, Bp, HIDDEN), lambda g: (g, 0, 0)),
                # W^T resident across the whole sequence (same block every step)
                pl.BlockSpec((HIDDEN, HIDDEN), lambda g: (0, 0)),
                # initial state, resident
                pl.BlockSpec((Bp, HIDDEN), lambda g: (0, 0)),
            ],
            out_specs=pl.BlockSpec((tt, Bp, HIDDEN), lambda g: (g, 0, 0)),
            scratch_shapes=[
                pltpu.VMEM((Bp, HIDDEN), jnp.float32),   # ESN state, persists over grid
            ],
        ),
        compiler_params=pltpu.CompilerParams(
            dimension_semantics=("arbitrary",),          # recurrence => sequential
            vmem_limit_bytes=_VMEM_LIMIT,
        ),
    )


# ----------------------------------------------------------------------------
# Stateful wrapper mirroring FixedRandomModel.forward (ESN part).
# ----------------------------------------------------------------------------
class FixedRandomModelPallas:

    def __init__(self, alpha):
        self.alpha = float(alpha)
        W_in = init_W_in_np(HIDDEN, LSIZE_FLAT)          # (512, 1024) == nn.Linear weight
        W = init_W_np(HIDDEN, HIDDEN)                    # (512, 512)  == init_W(512, 512)
        # Input projection weights in bf16 (fresh data each step, f32 accumulation);
        # recurrent weights in f32 so state error does not compound over long rollouts.
        self.win_t = jnp.asarray(W_in.T, jnp.bfloat16)   # (1024, 512)
        self.w_t = jnp.asarray(W.T, jnp.float32)         # (512, 512)
        self.x_esn = None                                # padded ESN state (Bp, 512) f32
        self._valid_b = None
        self._calls = {}

    # -- compiled-call cache ---------------------------------------------------
    def _get_call(self, key):
        if key not in self._calls:
            kind = key[0]
            if kind == "fresh":
                self._calls[key] = _build_fresh_call(key[1])
            elif kind == "step":
                self._calls[key] = _build_step_call(key[1], self.alpha)
            elif kind == "proj":
                _, Mp, tm = key
                self._calls[key] = _build_proj_call(Mp, tm)
            else:  # ("seq", Tp, Bp, fresh)
                _, Tp, Bp, fresh = key
                self._calls[key] = _build_seq_call(Tp, Bp, self.alpha, fresh, _TT)
        return self._calls[key]

    # -- single-step API (matches FixedRandomModel.forward) ---------------------
    def forward(self, x_conv):
        # x_conv: (B, 256, 2, 2) NCHW float32 — the VAE conv feature map.
        # NOTE: weight-DMA bound per call; prefer forward_sequence() for throughput.
        B = x_conv.shape[0]
        Bp = max(16, _round_up(B, 16))                   # bf16 native tile is (16, 128)
        x_flat = jnp.asarray(x_conv, jnp.float32).reshape(B, -1)        # == .view(B, -1)
        x_pad = jnp.zeros((Bp, LSIZE_FLAT), jnp.bfloat16).at[:B].set(
            x_flat.astype(jnp.bfloat16))

        fresh = (self.x_esn is None) or (self._valid_b != B)
        if fresh:
            x_esn_pad = self._get_call(("fresh", Bp))(x_pad, self.win_t)
        else:
            x_esn_pad = self._get_call(("step", Bp))(
                x_pad, self.win_t, self.w_t, self.x_esn)

        self.x_esn = x_esn_pad
        self._valid_b = B
        return x_flat, x_esn_pad[:B]

    # -- multi-step API: hoisted projection + time-blocked resident recurrence --
    def forward_sequence(self, x_conv_seq):
        # x_conv_seq: (T, B, 256, 2, 2) float32.
        T, B = x_conv_seq.shape[0], x_conv_seq.shape[1]
        Bp = max(16, _round_up(B, 16))
        Tp = _round_up(T, _TT)
        x_flat = jnp.asarray(x_conv_seq, jnp.float32).reshape(T, B, -1)  # (T, B, 1024)

        # Pad to (Tp, Bp, 1024) bf16; padded rows/steps are zero and discarded.
        x_pad = jnp.zeros((Tp, Bp, LSIZE_FLAT), jnp.bfloat16).at[:T, :B].set(
            x_flat.astype(jnp.bfloat16))

        # Phase 1 — hoisted input projection: one (Tp*Bp, 1024) @ (1024, 512) matmul.
        Mp = Tp * Bp                                     # multiple of _TM (=128)
        u = self._get_call(("proj", Mp, _TM))(
            x_pad.reshape(Mp, LSIZE_FLAT), self.win_t).reshape(Tp, Bp, HIDDEN)

        # Phase 2 — serial recurrence (K=512 only), weights + state VMEM-resident.
        fresh = (self.x_esn is None) or (self._valid_b != B)
        prev0 = jnp.zeros((Bp, HIDDEN), jnp.float32) if fresh else self.x_esn
        out_pad = self._get_call(("seq", Tp, Bp, fresh))(u, self.w_t, prev0)

        self.x_esn = out_pad[T - 1]
        self._valid_b = B
        return x_flat, out_pad[:T, :B]


# ----------------------------------------------------------------------------
# Pure-JAX reference (same mixed precision as the kernels: bf16 projection with
# f32 accumulation, f32 recurrent matmul).
# ----------------------------------------------------------------------------
def _ref_step(x_flat_f32, prev_f32, win_t_bf16, w_t_f32, alpha_eff):
    u = jnp.dot(x_flat_f32.astype(jnp.bfloat16), win_t_bf16,
                preferred_element_type=jnp.float32)
    r = jnp.dot(prev_f32, w_t_f32, preferred_element_type=jnp.float32)
    x_hat = jnp.tanh(u + r)
    return prev_f32 + alpha_eff * (x_hat - prev_f32)


if __name__ == "__main__":
    key = jax.random.PRNGKey(0)
    k1, k2, k3 = jax.random.split(key, 3)
    B = 2
    x_conv_1 = jax.random.normal(k1, (B, 256, 2, 2), jnp.float32)
    x_conv_2 = jax.random.normal(k2, (B, 256, 2, 2), jnp.float32)

    model = FixedRandomModelPallas(alpha=0.3)

    # First call: no ESN state -> x_esn = tanh(W_in x).
    flat1, esn1 = model.forward(x_conv_1)
    jax.block_until_ready(esn1)
    ref1 = _ref_step(flat1, jnp.zeros((B, HIDDEN), jnp.float32),
                     model.win_t, model.w_t, 1.0)
    np.testing.assert_allclose(np.asarray(esn1), np.asarray(ref1), rtol=5e-3, atol=5e-3)

    # Second call: stateful leaky-integrator update (split-dot kernel, no staging).
    flat2, esn2 = model.forward(x_conv_2)
    jax.block_until_ready(esn2)
    ref2 = _ref_step(flat2, esn1, model.win_t, model.w_t, model.alpha)
    np.testing.assert_allclose(np.asarray(esn2), np.asarray(ref2), rtol=5e-3, atol=5e-3)

    # Sequence path: hoisted projection + time-blocked resident-weight recurrence.
    T = 4
    x_conv_seq = jax.random.normal(k3, (T, B, 256, 2, 2), jnp.float32)
    model_seq = FixedRandomModelPallas(alpha=0.3)
    flat_seq, esn_seq = model_seq.forward_sequence(x_conv_seq)
    jax.block_until_ready(esn_seq)

    prev_k = jnp.zeros((B, HIDDEN), jnp.float32)
    for t in range(T):
        a = 1.0 if t == 0 else model_seq.alpha
        ref_t = _ref_step(flat_seq[t], prev_k, model_seq.win_t, model_seq.w_t, a)
        np.testing.assert_allclose(np.asarray(esn_seq[t]), np.asarray(ref_t),
                                   rtol=5e-3, atol=5e-3)
        prev_k = esn_seq[t]

    assert flat1.shape == (B, LSIZE_FLAT) and esn2.shape == (B, HIDDEN)
    assert esn_seq.shape == (T, B, HIDDEN)
    print("KERNEL_OK")
</pallas_src>

<mosaic_0001>
module attributes {stable_mosaic.version = 11 : i64} {
  func.func @esn_fresh_kernel(%arg0: memref<16x1024xbf16, #tpu.memory_space<vmem>>, %arg1: memref<1024x512xbf16, #tpu.memory_space<vmem>>, %arg2: memref<16x512xf32, #tpu.memory_space<vmem>>) attributes {dimension_semantics = [], scalar_prefetch = 0 : i64, scratch_operands = 0 : i64, tpu.core_type = #tpu.core_type<tc>} {
    %c0 = arith.constant 0 : index
    %c0_0 = arith.constant 0 : index
    %0 = vector.load %arg0[%c0, %c0_0] : memref<16x1024xbf16, #tpu.memory_space<vmem>>, vector<16x1024xbf16>
    %c0_1 = arith.constant 0 : index
    %c0_2 = arith.constant 0 : index
    %1 = vector.load %arg1[%c0_1, %c0_2] : memref<1024x512xbf16, #tpu.memory_space<vmem>>, vector<1024x512xbf16>
    %cst = arith.constant dense<0.000000e+00> : vector<16x512xf32>
    %2 = tpu.matmul %0, %1, %cst {dimension_numbers = #tpu.dot_dimension_numbers<[1], [0], [0], [1], [0, 0, 1, 1], [], []>} : vector<16x1024xbf16>, vector<1024x512xbf16>, vector<16x512xf32> -> vector<16x512xf32>
    %3 = math.tanh %2 : vector<16x512xf32>
    %c0_3 = arith.constant 0 : index
    %c0_4 = arith.constant 0 : index
    %4 = vector.load %arg2[%c0_3, %c0_4] : memref<16x512xf32, #tpu.memory_space<vmem>>, vector<16x512xf32>
    tpu.vector_store %arg2[%c0_3, %c0_4], %3 {strides = array<i32>} : memref<16x512xf32, #tpu.memory_space<vmem>>, vector<16x512xf32>,
    return
  }
}

</mosaic_0001>

<bundles_post_ra>
// kernel: tpu_custom_call.1
= control target key start
LH: loop header
LB: loop body
LE: loop exit
PB: predicated region body
PF: predicated region fallthrough
CT: control target
= control target key end

     0   :  { %7 = vsyncpa [#allocation3], 0  ;;  %s2857_s0 = inlined_call_operand.hbm [shape: bf16[16,1024], index: 0, kind: input, shape index: {}]   ;;  %s2858_s1 = inlined_call_operand.hbm [shape: bf16[1024,512], index: 1, kind: input, shape index: {}]   ;;  %s2859_s2 = inlined_call_operand.hbm [shape: f32[16,512], index: 2, kind: output, shape index: {}]  }
   0x1   :  { %8 = vsyncpa [#allocation6], 0 }
   0x2   :  { %9 = vsyncpa [#allocation4], 0  ;;  %s2769_s9 = smov [#allocation2]   ;;  %s2697_s13 = scalar_lea.hbm %s2857_s0, 1024 }
   0x3   :  { %s15_s10 = sshll.u32 %s2769_s9, 4  ;;  %p2698_p0 = scmp.ne.s32.totalorder %s2857_s0, %s2697_s13  ;;  %s16_s10 = int_to_ptr.vmem [resolvable:$true] %s15_s10 }
   0x4   :  { %p2701_p1 = scmp.lt.u32.totalorder %s2697_s13, %s2857_s0 }
   0x6   :  { %p2703_p2 = pnand %p2701_p1, %p2698_p0 }
   0x8   :  { %2706 = shalt.err (!%p2703_p2)
}
   0x9   :  { %s2707_s18 = scalar_lea.vmem %s16_s10, 1024  ;;  %p2712_p4 = scmp.lt.s32.totalorder %s16_s10, %s16_s10 }
   0xa   :  { %p2708_p3 = scmp.ne.s32.totalorder %s16_s10, %s2707_s18  ;;  %p2713_p5 = scmp.lt.s32.totalorder %s2707_s18, %s2707_s18 }
   0xc   :  { %p2714_p6 = por %p2713_p5, %p2712_p4 }
   0xe   :  { %p2715_p7 = pnand %p2714_p6, %p2708_p3 }
  0x10   :  { %2718 = shalt.err (!%p2715_p7)
}
  0x11   :  { %s2770_s19 = smov 512   ;;  %s2771_s20 = smov 32  }
  0x12   :  { %21 = dma.hbm_to_vmem [thread:$0]  %s2857_s0, 1024, %s16_s10, [#allocation3], %s2770_s19, %s2770_s19, %s2771_s20  }
  0x13   :  { %s2772_s23 = smov [#allocation5]   ;;  %s2719_s27 = scalar_lea.hbm %s2858_s1, 32768 }
  0x14   :  { %s27_s24 = sshll.u32 %s2772_s23, 4  ;;  %p2720_p8 = scmp.ne.s32.totalorder %s2858_s1, %s2719_s27  ;;  %s28_s24 = int_to_ptr.vmem [resolvable:$true] %s27_s24 }
  0x15   :  { %p2723_p9 = scmp.lt.u32.totalorder %s2719_s27, %s2858_s1 }
  0x17   :  { %p2725_p10 = pnand %p2723_p9, %p2720_p8 }
  0x19   :  { %2728 = shalt.err (!%p2725_p10)
}
  0x1a   :  { %s2729_s4 = scalar_lea.vmem %s28_s24, 32768  ;;  %p2734_p12 = scmp.lt.s32.totalorder %s28_s24, %s28_s24 }
  0x1b   :  { %p2730_p11 = scmp.ne.s32.totalorder %s28_s24, %s2729_s4  ;;  %p2735_p13 = scmp.lt.s32.totalorder %s2729_s4, %s2729_s4 }
  0x1d   :  { %p2736_p0 = por %p2735_p13, %p2734_p12 }
  0x1f   :  { %p2737_p1 = pnand %p2736_p0, %p2730_p11 }
  0x21   :  { %2740 = shalt.err (!%p2737_p1)
}
  0x22   :  { %s2773_s0 = smov 256   ;;  %s2774_s5 = smov 16  }
  0x23   :  { %33 = dma.hbm_to_vmem [thread:$0]  %s2858_s1, 32768, %s28_s24, [#allocation6], %s2773_s0, %s2773_s0, %s2774_s5  }
  0x24   :  { %2763 = dma.done.wait [#allocation3], 1024  }
  0x25   :  { %2764 = vsyncadd [#allocation3], 4294966272 }
  0x26   :  { %2765 = dma.done.wait [#allocation6], 32768  }
  0x27   :  { %2766 = vsyncadd [#allocation6], 4294934528  ;;  %v2297_v0 = vld [vmem:[#allocation5 + $0x4] ss:$16 sps:$4 sm:$0xff]   ;;  %v2299_v1 = vld [vmem:[#allocation5 + $0xc] ss:$16 sps:$4 sm:$0xff]  }
  0x28   :  { %1624 = vmatprep.subr.bf16.mxu0 %v2297_v0  ;;  %v2301_v2 = vld [vmem:[#allocation5] ss:$16 sps:$4 sm:$0xff]   ;;  %v2302_v3 = vld [vmem:[#allocation5 + $0x8] ss:$16 sps:$4 sm:$0xff]   ;;  %1796 = vmatprep.subr.bf16.mxu1 %v2299_v1  ;;  %v2303_v4 = vld [vmem:[#allocation5 + $0x24] ss:$16 sps:$4 sm:$0xff]  }
  0x29   :  { %1625 = vmatpush1.bf16.msra.mxu0 %v2301_v2  ;;  %1797 = vmatpush1.bf16.msra.mxu1 %v2302_v3  ;;  %v2305_v5 = vld [vmem:[#allocation5 + $0x2c] ss:$16 sps:$4 sm:$0xff]   ;;  %v2307_v6 = vld [vmem:[#allocation5 + $0x20] ss:$16 sps:$4 sm:$0xff]   ;;  %v2308_v7 = vld [vmem:[#allocation5 + $0x28] ss:$16 sps:$4 sm:$0xff]  }
  0x2a   :  { %1626 = vmatprep.subr.bf16.mxu0 %v2303_v4  ;;  %1798 = vmatprep.subr.bf16.mxu1 %v2305_v5  ;;  %v2309_v8 = vld [vmem:[#allocation5 + $0x44] ss:$16 sps:$4 sm:$0xff]   ;;  %v2311_v9 = vld [vmem:[#allocation5 + $0x4c] ss:$16 sps:$4 sm:$0xff]   ;;  %v2313_v10 = vld [vmem:[#allocation5 + $0x40] ss:$16 sps:$4 sm:$0xff]  }
  0x2b   :  { %v2314_v11 = vld [vmem:[#allocation5 + $0x48] ss:$16 sps:$4 sm:$0xff]   ;;  %v2315_v12 = vld [vmem:[#allocation5 + $0x64] ss:$16 sps:$4 sm:$0xff]   ;;  %v2317_v13 = vld [vmem:[#allocation5 + $0x6c] ss:$16 sps:$4 sm:$0xff]  }
  0x2c   :  { %v2319_v14 = vld [vmem:[#allocation5 + $0x60] ss:$16 sps:$4 sm:$0xff]   ;;  %v2320_v15 = vld [vmem:[#allocation5 + $0x68] ss:$16 sps:$4 sm:$0xff]   ;;  %v2321_v16 = vld [vmem:[#allocation5 + $0x84] ss:$16 sps:$4 sm:$0xff]  }
  0x2d   :  { %1627 = vmatpush1.bf16.msra.mxu0 %v2307_v6  ;;  %1799 = vmatpush1.bf16.msra.mxu1 %v2308_v7  ;;  %v2323_v17 = vld [vmem:[#allocation5 + $0x8c] ss:$16 sps:$4 sm:$0xff]   ;;  %v2325_v18 = vld [vmem:[#allocation5 + $0x80] ss:$16 sps:$4 sm:$0xff]   ;;  %v2326_v19 = vld [vmem:[#allocation5 + $0x88] ss:$16 sps:$4 sm:$0xff]  }
  0x2e   :  { %1628 = vmatprep.subr.bf16.mxu0 %v2309_v8  ;;  %1800 = vmatprep.subr.bf16.mxu1 %v2311_v9  ;;  %v2327_v20 = vld [vmem:[#allocation5 + $0xa4] ss:$16 sps:$4 sm:$0xff]   ;;  %v2329_v21 = vld [vmem:[#allocation5 + $0xac] ss:$16 sps:$4 sm:$0xff]   ;;  %v2331_v22 = vld [vmem:[#allocation5 + $0xa0] ss:$16 sps:$4 sm:$0xff]  }
  0x2f   :  { %v2332_v23 = vld [vmem:[#allocation5 + $0xa8] ss:$16 sps:$4 sm:$0xff]   ;;  %v2333_v24 = vld [vmem:[#allocation5 + $0xc4] ss:$16 sps:$4 sm:$0xff]   ;;  %v2335_v25 = vld [vmem:[#allocation5 + $0xcc] ss:$16 sps:$4 sm:$0xff]  }
  0x30   :  { %v2337_v26 = vld [vmem:[#allocation5 + $0xc0] ss:$16 sps:$4 sm:$0xff]   ;;  %v2338_v27 = vld [vmem:[#allocation5 + $0xc8] ss:$16 sps:$4 sm:$0xff]   ;;  %v2339_v28 = vld [vmem:[#allocation5 + $0xe4] ss:$16 sps:$4 sm:$0xff]  }
  0x31   :  { %1629 = vmatpush1.bf16.msra.mxu0 %v2313_v10  ;;  %1801 = vmatpush1.bf16.msra.mxu1 %v2314_v11  ;;  %v2341_v29 = vld [vmem:[#allocation5 + $0xec] ss:$16 sps:$4 sm:$0xff]   ;;  %v2343_v30 = vld [vmem:[#allocation5 + $0xe0] ss:$16 sps:$4 sm:$0xff]   ;;  %v2344_v31 = vld [vmem:[#allocation5 + $0xe8] ss:$16 sps:$4 sm:$0xff]  }
  0x32   :  { %1630 = vmatprep.subr.bf16.mxu0 %v2315_v12  ;;  %1802 = vmatprep.subr.bf16.mxu1 %v2317_v13  ;;  %v2345_v32 = vld [vmem:[#allocation5 + $0x104] ss:$16 sps:$4 sm:$0xff]   ;;  %v2347_v33 = vld [vmem:[#allocation5 + $0x10c] ss:$16 sps:$4 sm:$0xff]   ;;  %v2349_v34 = vld [vmem:[#allocation5 + $0x100] ss:$16 sps:$4 sm:$0xff]  }
  0x33   :  { %v2350_v35 = vld [vmem:[#allocation5 + $0x108] ss:$16 sps:$4 sm:$0xff]   ;;  %v2351_v36 = vld [vmem:[#allocation5 + $0x124] ss:$16 sps:$4 sm:$0xff]   ;;  %v2353_v37 = vld [vmem:[#allocation5 + $0x12c] ss:$16 sps:$4 sm:$0xff]  }
  0x34   :  { %v2355_v38 = vld [vmem:[#allocation5 + $0x120] ss:$16 sps:$4 sm:$0xff]   ;;  %v2356_v39 = vld [vmem:[#allocation5 + $0x128] ss:$16 sps:$4 sm:$0xff]   ;;  %v2357_v40 = vld [vmem:[#allocation5 + $0x144] ss:$16 sps:$4 sm:$0xff]  }
  0x35   :  { %1631 = vmatpush1.bf16.msra.mxu0 %v2319_v14  ;;  %1803 = vmatpush1.bf16.msra.mxu1 %v2320_v15  ;;  %v2359_v41 = vld [vmem:[#allocation5 + $0x14c] ss:$16 sps:$4 sm:$0xff]   ;;  %v2361_v42 = vld [vmem:[#allocation5 + $0x140] ss:$16 sps:$4 sm:$0xff]   ;;  %v2362_v43 = vld [vmem:[#allocation5 + $0x148] ss:$16 sps:$4 sm:$0xff]  }
  0x36   :  { %1632 = vmatprep.subr.bf16.mxu0 %v2321_v16  ;;  %1804 = vmatprep.subr.bf16.mxu1 %v2323_v17  ;;  %v2363_v44 = vld [vmem:[#allocation5 + $0x164] ss:$16 sps:$4 sm:$0xff]   ;;  %v2365_v45 = vld [vmem:[#allocation5 + $0x16c] ss:$16 sps:$4 sm:$0xff]   ;;  %v2367_v48 = vld [vmem:[#allocation5 + $0x160] ss:$16 sps:$4 sm:$0xff]  }
  0x37   :  { %v40_v46 = vld [vmem:[#allocation2] sm:$0xff]  ;;  %v2368_v49 = vld [vmem:[#allocation5 + $0x168] ss:$16 sps:$4 sm:$0xff]   ;;  %v2371_v52 = vld [vmem:[#allocation5 + $0x18c] ss:$16 sps:$4 sm:$0xff]   ;;  %s2775_s1 = smov [#allocation7]  }
  0x38   :  { %v44_v47 = vld [vmem:[#allocation2 + $0x20] sm:$0xff]  ;;  %v2374_v54 = vld [vmem:[#allocation5 + $0x188] ss:$16 sps:$4 sm:$0xff]   ;;  %v2377_v56 = vld [vmem:[#allocation5 + $0x1ac] ss:$16 sps:$4 sm:$0xff]   ;;  %s1989_s8 = sshll.u32 %s2775_s1, 4  ;;  %s1990_s8 = int_to_ptr.vmem [resolvable:$true] %s1989_s8 }
  0x39   :  { %1633 = vmatpush1.bf16.msra.mxu0 %v2325_v18  ;;  %1805 = vmatpush1.bf16.msra.mxu1 %v2326_v19  ;;  %v2003_v50 = vcombine.high %v40_v46, %v44_v47  ;;  %v2369_v51 = vld [vmem:[#allocation5 + $0x184] ss:$16 sps:$4 sm:$0xff]   ;;  %v2373_v53 = vld [vmem:[#allocation5 + $0x180] ss:$16 sps:$4 sm:$0xff]   ;;  %v2380_v58 = vld [vmem:[#allocation5 + $0x1a8] ss:$16 sps:$4 sm:$0xff]   ;;  %v2002_v5 = vcombine.low %v40_v46, %v44_v47  ;;  %p2746_p3 = scmp.lt.s32.totalorder %s1990_s8, %s1990_s8 }
  0x3a   :  { %1634 = vmatprep.subr.bf16.mxu0 %v2327_v20  ;;  %1806 = vmatprep.subr.bf16.mxu1 %v2329_v21  ;;  %v2375_v55 = vld [vmem:[#allocation5 + $0x1a4] ss:$16 sps:$4 sm:$0xff]   ;;  %v2379_v57 = vld [vmem:[#allocation5 + $0x1a0] ss:$16 sps:$4 sm:$0xff]   ;;  %v2383_v60 = vld [vmem:[#allocation5 + $0x1cc] ss:$16 sps:$4 sm:$0xff]  }
  0x3b   :  { %1656 = vmatprep.mubr.bf16.mxu0 %v2003_v50  ;;  %1828 = vmatprep.mubr.bf16.mxu1 %v2003_v50  ;;  %v2381_v59 = vld [vmem:[#allocation5 + $0x1c4] ss:$16 sps:$4 sm:$0xff]   ;;  %v2385_v61 = vld [vmem:[#allocation5 + $0x1c0] ss:$16 sps:$4 sm:$0xff]   ;;  %v2386_v62 = vld [vmem:[#allocation5 + $0x1c8] ss:$16 sps:$4 sm:$0xff]  }
  0x3c   :  { %v2387_v63 = vld [vmem:[#allocation5 + $0x1e4] ss:$16 sps:$4 sm:$0xff]   ;;  %v2389_v0 = vld [vmem:[#allocation5 + $0x1ec] ss:$16 sps:$4 sm:$0xff]   ;;  %v2391_v1 = vld [vmem:[#allocation5 + $0x1e0] ss:$16 sps:$4 sm:$0xff]  }
  0x3d   :  { %1635 = vmatpush1.bf16.msra.mxu0 %v2331_v22  ;;  %1807 = vmatpush1.bf16.msra.mxu1 %v2332_v23  ;;  %v2392_v2 = vld [vmem:[#allocation5 + $0x1e8] ss:$16 sps:$4 sm:$0xff]   ;;  %v2395_v3 = vld [vmem:[#allocation5 + $0x204] ss:$16 sps:$4 sm:$0xff]   ;;  %v2398_v4 = vld [vmem:[#allocation5 + $0x20c] ss:$16 sps:$4 sm:$0xff]  }
  0x3e   :  { %1636 = vmatprep.subr.bf16.mxu0 %v2333_v24  ;;  %1808 = vmatprep.subr.bf16.mxu1 %v2335_v25  ;;  %v2393_v6 = vld [vmem:[#allocation5 + $0x200] ss:$16 sps:$4 sm:$0xff]   ;;  %v2396_v7 = vld [vmem:[#allocation5 + $0x208] ss:$16 sps:$4 sm:$0xff]   ;;  %v2401_v8 = vld [vmem:[#allocation5 + $0x224] ss:$16 sps:$4 sm:$0xff]  }
  0x3f   :  { %v2404_v9 = vld [vmem:[#allocation5 + $0x22c] ss:$16 sps:$4 sm:$0xff]   ;;  %v2399_v10 = vld [vmem:[#allocation5 + $0x220] ss:$16 sps:$4 sm:$0xff]   ;;  %v2402_v11 = vld [vmem:[#allocation5 + $0x228] ss:$16 sps:$4 sm:$0xff]  }
  0x40   :  { %v2407_v12 = vld [vmem:[#allocation5 + $0x244] ss:$16 sps:$4 sm:$0xff]   ;;  %v2410_v13 = vld [vmem:[#allocation5 + $0x24c] ss:$16 sps:$4 sm:$0xff]   ;;  %v2405_v14 = vld [vmem:[#allocation5 + $0x240] ss:$16 sps:$4 sm:$0xff]  }
  0x41   :  { %1637 = vmatpush1.bf16.msra.mxu0 %v2337_v26  ;;  %1809 = vmatpush1.bf16.msra.mxu1 %v2338_v27  ;;  %v2408_v15 = vld [vmem:[#allocation5 + $0x248] ss:$16 sps:$4 sm:$0xff]   ;;  %v2413_v16 = vld [vmem:[#allocation5 + $0x264] ss:$16 sps:$4 sm:$0xff]   ;;  %v2416_v17 = vld [vmem:[#allocation5 + $0x26c] ss:$16 sps:$4 sm:$0xff]  }
  0x42   :  { %1638 = vmatprep.subr.bf16.mxu0 %v2339_v28  ;;  %1810 = vmatprep.subr.bf16.mxu1 %v2341_v29  ;;  %v2411_v18 = vld [vmem:[#allocation5 + $0x260] ss:$16 sps:$4 sm:$0xff]   ;;  %v2414_v19 = vld [vmem:[#allocation5 + $0x268] ss:$16 sps:$4 sm:$0xff]   ;;  %v2419_v20 = vld [vmem:[#allocation5 + $0x284] ss:$16 sps:$4 sm:$0xff]  }
  0x43   :  { %v2422_v21 = vld [vmem:[#allocation5 + $0x28c] ss:$16 sps:$4 sm:$0xff]   ;;  %v2417_v22 = vld [vmem:[#allocation5 + $0x280] ss:$16 sps:$4 sm:$0xff]   ;;  %v2420_v23 = vld [vmem:[#allocation5 + $0x288] ss:$16 sps:$4 sm:$0xff]  }
  0x44   :  { %v2425_v24 = vld [vmem:[#allocation5 + $0x2a4] ss:$16 sps:$4 sm:$0xff]   ;;  %v2428_v25 = vld [vmem:[#allocation5 + $0x2ac] ss:$16 sps:$4 sm:$0xff]   ;;  %v2423_v26 = vld [vmem:[#allocation5 + $0x2a0] ss:$16 sps:$4 sm:$0xff]  }
  0x45   :  { %1639 = vmatpush1.bf16.msra.mxu0 %v2343_v30  ;;  %1811 = vmatpush1.bf16.msra.mxu1 %v2344_v31  ;;  %v2426_v27 = vld [vmem:[#allocation5 + $0x2a8] ss:$16 sps:$4 sm:$0xff]   ;;  %v2431_v28 = vld [vmem:[#allocation5 + $0x2c4] ss:$16 sps:$4 sm:$0xff]   ;;  %v2434_v29 = vld [vmem:[#allocation5 + $0x2cc] ss:$16 sps:$4 sm:$0xff]  }
  0x46   :  { %1640 = vmatprep.subr.bf16.mxu0 %v2345_v32  ;;  %1812 = vmatprep.subr.bf16.mxu1 %v2347_v33  ;;  %v2818_v30 = vld [vmem:[#allocation2 + $0x8] sm:$0xff]  ;;  %v2429_v32 = vld [vmem:[#allocation5 + $0x2c0] ss:$16 sps:$4 sm:$0xff]   ;;  %v2455_v47 = vld [vmem:[#allocation5 + $0x344] ss:$16 sps:$4 sm:$0xff]   ;;  %s2741_s9 = scalar_lea.vmem %s1990_s8, 1024 }
  0x47   :  { %v2820_v31 = vld [vmem:[#allocation2 + $0x28] sm:$0xff]  ;;  %p2742_p2 = scmp.ne.s32.totalorder %s1990_s8, %s2741_s9  ;;  %p2747_p4 = scmp.lt.s32.totalorder %s2741_s9, %s2741_s9 }
  0x48   :  { %v2432_v33 = vld [vmem:[#allocation5 + $0x2c8] ss:$16 sps:$4 sm:$0xff]  }
  0x49   :  { %1641 = vmatpush1.bf16.msra.mxu0 %v2349_v34  ;;  %1813 = vmatpush1.bf16.msra.mxu1 %v2350_v35  ;;  %v2005_v34 = vcombine.high %v2818_v30, %v2820_v31  ;;  %v2437_v35 = vld [vmem:[#allocation5 + $0x2e4] ss:$16 sps:$4 sm:$0xff]   ;;  %v2450_v46 = vld [vmem:[#allocation5 + $0x328] ss:$16 sps:$4 sm:$0xff]   ;;  %p2748_p5 = por %p2747_p4, %p2746_p3 }
  0x4a   :  { %1642 = vmatprep.subr.bf16.mxu0 %v2351_v36  ;;  %1814 = vmatprep.subr.bf16.mxu1 %v2353_v37  ;;  %v2440_v36 = vld [vmem:[#allocation5 + $0x2ec] ss:$16 sps:$4 sm:$0xff]   ;;  %v2435_v37 = vld [vmem:[#allocation5 + $0x2e0] ss:$16 sps:$4 sm:$0xff]   ;;  %v2456_v50 = vld [vmem:[#allocation5 + $0x348] ss:$16 sps:$4 sm:$0xff]  }
  0x4b   :  { %p2749_p6 = pnand %p2748_p5, %p2742_p2 }
  0x4d   :  { %1643 = vmatpush1.bf16.msra.mxu0 %v2355_v38  ;;  %1815 = vmatpush1.bf16.msra.mxu1 %v2356_v39  ;;  %v2438_v38 = vld [vmem:[#allocation5 + $0x2e8] ss:$16 sps:$4 sm:$0xff]   ;;  %v2443_v39 = vld [vmem:[#allocation5 + $0x304] ss:$16 sps:$4 sm:$0xff]  }
  0x4e   :  { %1644 = vmatprep.subr.bf16.mxu0 %v2357_v40  ;;  %1816 = vmatprep.subr.bf16.mxu1 %v2359_v41  ;;  %v2446_v40 = vld [vmem:[#allocation5 + $0x30c] ss:$16 sps:$4 sm:$0xff]   ;;  %v2441_v41 = vld [vmem:[#allocation5 + $0x300] ss:$16 sps:$4 sm:$0xff]  }
  0x51   :  { %1645 = vmatpush1.bf16.msra.mxu0 %v2361_v42  ;;  %1817 = vmatpush1.bf16.msra.mxu1 %v2362_v43  ;;  %v2444_v42 = vld [vmem:[#allocation5 + $0x308] ss:$16 sps:$4 sm:$0xff]   ;;  %v2449_v43 = vld [vmem:[#allocation5 + $0x324] ss:$16 sps:$4 sm:$0xff]  }
  0x52   :  { %1646 = vmatprep.subr.bf16.mxu0 %v2363_v44  ;;  %1818 = vmatprep.subr.bf16.mxu1 %v2365_v45  ;;  %v2452_v44 = vld [vmem:[#allocation5 + $0x32c] ss:$16 sps:$4 sm:$0xff]   ;;  %v2447_v45 = vld [vmem:[#allocation5 + $0x320] ss:$16 sps:$4 sm:$0xff]  }
  0x55   :  { %1647 = vmatpush1.bf16.msra.mxu0 %v2367_v48  ;;  %1819 = vmatpush1.bf16.msra.mxu1 %v2368_v49  ;;  %v2458_v48 = vld [vmem:[#allocation5 + $0x34c] ss:$16 sps:$4 sm:$0xff]   ;;  %v2453_v49 = vld [vmem:[#allocation5 + $0x340] ss:$16 sps:$4 sm:$0xff]  }
  0x56   :  { %1648 = vmatprep.subr.bf16.mxu0 %v2369_v51  ;;  %1820 = vmatprep.subr.bf16.mxu1 %v2371_v52  ;;  %v2461_v51 = vld [vmem:[#allocation5 + $0x364] ss:$16 sps:$4 sm:$0xff]   ;;  %v2464_v52 = vld [vmem:[#allocation5 + $0x36c] ss:$16 sps:$4 sm:$0xff]  }
  0x59   :  { %1649 = vmatpush1.bf16.msra.mxu0 %v2373_v53  ;;  %1821 = vmatpush1.bf16.msra.mxu1 %v2374_v54  ;;  %v2459_v53 = vld [vmem:[#allocation5 + $0x360] ss:$16 sps:$4 sm:$0xff]   ;;  %v2462_v54 = vld [vmem:[#allocation5 + $0x368] ss:$16 sps:$4 sm:$0xff]  }
  0x5a   :  { %1650 = vmatprep.subr.bf16.mxu0 %v2375_v55  ;;  %1822 = vmatprep.subr.bf16.mxu1 %v2377_v56  ;;  %v2467_v55 = vld [vmem:[#allocation5 + $0x384] ss:$16 sps:$4 sm:$0xff]   ;;  %v2470_v56 = vld [vmem:[#allocation5 + $0x38c] ss:$16 sps:$4 sm:$0xff]  }
  0x5d   :  { %1651 = vmatpush1.bf16.msra.mxu0 %v2379_v57  ;;  %1823 = vmatpush1.bf16.msra.mxu1 %v2380_v58  ;;  %v2465_v57 = vld [vmem:[#allocation5 + $0x380] ss:$16 sps:$4 sm:$0xff]   ;;  %v2468_v58 = vld [vmem:[#allocation5 + $0x388] ss:$16 sps:$4 sm:$0xff]  }
  0x5e   :  { %1652 = vmatprep.subr.bf16.mxu0 %v2381_v59  ;;  %1824 = vmatprep.subr.bf16.mxu1 %v2383_v60  ;;  %v2473_v59 = vld [vmem:[#allocation5 + $0x3a4] ss:$16 sps:$4 sm:$0xff]   ;;  %v2476_v60 = vld [vmem:[#allocation5 + $0x3ac] ss:$16 sps:$4 sm:$0xff]  }
  0x61   :  { %1653 = vmatpush1.bf16.msra.mxu0 %v2385_v61  ;;  %1825 = vmatpush1.bf16.msra.mxu1 %v2386_v62  ;;  %v2471_v61 = vld [vmem:[#allocation5 + $0x3a0] ss:$16 sps:$4 sm:$0xff]   ;;  %v2474_v62 = vld [vmem:[#allocation5 + $0x3a8] ss:$16 sps:$4 sm:$0xff]  }
  0x62   :  { %1654 = vmatprep.subr.bf16.mxu0 %v2387_v63  ;;  %1826 = vmatprep.subr.bf16.mxu1 %v2389_v0  ;;  %v2479_v63 = vld [vmem:[#allocation5 + $0x3c4] ss:$16 sps:$4 sm:$0xff]   ;;  %v2482_v0 = vld [vmem:[#allocation5 + $0x3cc] ss:$16 sps:$4 sm:$0xff]  }
  0x65   :  { %1655 = vmatpush1.bf16.msra.mxu0 %v2391_v1  ;;  %1827 = vmatpush1.bf16.msra.mxu1 %v2392_v2  ;;  %v2477_v1 = vld [vmem:[#allocation5 + $0x3c0] ss:$16 sps:$4 sm:$0xff]   ;;  %v2480_v2 = vld [vmem:[#allocation5 + $0x3c8] ss:$16 sps:$4 sm:$0xff]  }
  0x66   :  { %1667 = vmatprep.subr.bf16.mxu0 %v2395_v3  ;;  %1839 = vmatprep.subr.bf16.mxu1 %v2398_v4  ;;  %v2485_v3 = vld [vmem:[#allocation5 + $0x3e4] ss:$16 sps:$4 sm:$0xff]   ;;  %v2488_v4 = vld [vmem:[#allocation5 + $0x3ec] ss:$16 sps:$4 sm:$0xff]  }
  0x68   :  { %1657 = vmatmul.mubr.bf16.vlgmr.msra.gmra.mrb[0].mxu0 %v2002_v5  ;;  %1829 = vmatmul.mubr.bf16.vlgmr.msra.gmra.mrb[0].mxu1 %v2002_v5  ;;  %v2483_v5 = vld [vmem:[#allocation5 + $0x3e0] ss:$16 sps:$4 sm:$0xff]  }
  0x69   :  { %1668 = vmatpush1.bf16.msra.mxu0 %v2393_v6  ;;  %1840 = vmatpush1.bf16.msra.mxu1 %v2396_v7  ;;  %v2486_v6 = vld [vmem:[#allocation5 + $0x3e8] ss:$16 sps:$4 sm:$0xff]   ;;  %v2491_v7 = vld [vmem:[#allocation5 + $0x404] ss:$16 sps:$4 sm:$0xff]  }
  0x6a   :  { %1669 = vmatprep.subr.bf16.mxu0 %v2401_v8  ;;  %1841 = vmatprep.subr.bf16.mxu1 %v2404_v9  ;;  %v2494_v8 = vld [vmem:[#allocation5 + $0x40c] ss:$16 sps:$4 sm:$0xff]   ;;  %v2004_v9 = vcombine.low %v2818_v30, %v2820_v31  ;;  %v2516_v30 = vld [vmem:[#allocation5 + $0x488] ss:$16 sps:$4 sm:$0xff]   ;;  %v2521_v31 = vld [vmem:[#allocation5 + $0x4a4] ss:$16 sps:$4 sm:$0xff]  }
  0x6b   :  { %1699 = vmatprep.mubr.bf16.mxu0 %v2005_v34  ;;  %1871 = vmatprep.mubr.bf16.mxu1 %v2005_v34  ;;  %v2522_v34 = vld [vmem:[#allocation5 + $0x4a8] ss:$16 sps:$4 sm:$0xff]  }
  0x6d   :  { %1670 = vmatpush1.bf16.msra.mxu0 %v2399_v10  ;;  %1842 = vmatpush1.bf16.msra.mxu1 %v2402_v11  ;;  %v2489_v10 = vld [vmem:[#allocation5 + $0x400] ss:$16 sps:$4 sm:$0xff]   ;;  %v2492_v11 = vld [vmem:[#allocation5 + $0x408] ss:$16 sps:$4 sm:$0xff]  }
  0x6e   :  { %1671 = vmatprep.subr.bf16.mxu0 %v2407_v12  ;;  %1843 = vmatprep.subr.bf16.mxu1 %v2410_v13  ;;  %v2497_v12 = vld [vmem:[#allocation5 + $0x424] ss:$16 sps:$4 sm:$0xff]   ;;  %v2500_v13 = vld [vmem:[#allocation5 + $0x42c] ss:$16 sps:$4 sm:$0xff]  }
  0x71   :  { %1672 = vmatpush1.bf16.msra.mxu0 %v2405_v14  ;;  %1844 = vmatpush1.bf16.msra.mxu1 %v2408_v15  ;;  %v2826_v14 = vld [vmem:[#allocation2 + $0x10] sm:$0xff] }
  0x72   :  { %1673 = vmatprep.subr.bf16.mxu0 %v2413_v16  ;;  %1845 = vmatprep.subr.bf16.mxu1 %v2416_v17  ;;  %v2828_v15 = vld [vmem:[#allocation2 + $0x30] sm:$0xff] }
  0x73   :  { %v2007_v16 = vcombine.high %v2826_v14, %v2828_v15  ;;  %v2495_v17 = vld [vmem:[#allocation5 + $0x420] ss:$16 sps:$4 sm:$0xff]  }
  0x75   :  { %1674 = vmatpush1.bf16.msra.mxu0 %v2411_v18  ;;  %1846 = vmatpush1.bf16.msra.mxu1 %v2414_v19  ;;  %v2498_v18 = vld [vmem:[#allocation5 + $0x428] ss:$16 sps:$4 sm:$0xff]   ;;  %v2503_v19 = vld [vmem:[#allocation5 + $0x444] ss:$16 sps:$4 sm:$0xff]  }
  0x76   :  { %1675 = vmatprep.subr.bf16.mxu0 %v2419_v20  ;;  %1847 = vmatprep.subr.bf16.mxu1 %v2422_v21  ;;  %v2506_v20 = vld [vmem:[#allocation5 + $0x44c] ss:$16 sps:$4 sm:$0xff]   ;;  %v2501_v21 = vld [vmem:[#allocation5 + $0x440] ss:$16 sps:$4 sm:$0xff]  }
  0x79   :  { %1676 = vmatpush1.bf16.msra.mxu0 %v2417_v22  ;;  %1848 = vmatpush1.bf16.msra.mxu1 %v2420_v23  ;;  %v2504_v22 = vld [vmem:[#allocation5 + $0x448] ss:$16 sps:$4 sm:$0xff]   ;;  %v2509_v23 = vld [vmem:[#allocation5 + $0x464] ss:$16 sps:$4 sm:$0xff]  }
  0x7a   :  { %1677 = vmatprep.subr.bf16.mxu0 %v2425_v24  ;;  %1849 = vmatprep.subr.bf16.mxu1 %v2428_v25  ;;  %v2512_v24 = vld [vmem:[#allocation5 + $0x46c] ss:$16 sps:$4 sm:$0xff]   ;;  %v2507_v25 = vld [vmem:[#allocation5 + $0x460] ss:$16 sps:$4 sm:$0xff]  }
  0x7d   :  { %1678 = vmatpush1.bf16.msra.mxu0 %v2423_v26  ;;  %1850 = vmatpush1.bf16.msra.mxu1 %v2426_v27  ;;  %v2510_v26 = vld [vmem:[#allocation5 + $0x468] ss:$16 sps:$4 sm:$0xff]   ;;  %v2515_v27 = vld [vmem:[#allocation5 + $0x484] ss:$16 sps:$4 sm:$0xff]  }
  0x7e   :  { %1679 = vmatprep.subr.bf16.mxu0 %v2431_v28  ;;  %1851 = vmatprep.subr.bf16.mxu1 %v2434_v29  ;;  %v2518_v28 = vld [vmem:[#allocation5 + $0x48c] ss:$16 sps:$4 sm:$0xff]   ;;  %v2513_v29 = vld [vmem:[#allocation5 + $0x480] ss:$16 sps:$4 sm:$0xff]  }
  0x81   :  { %1680 = vmatpush1.bf16.msra.mxu0 %v2429_v32  ;;  %1852 = vmatpush1.bf16.msra.mxu1 %v2432_v33  ;;  %v2524_v32 = vld [vmem:[#allocation5 + $0x4ac] ss:$16 sps:$4 sm:$0xff]   ;;  %v2519_v33 = vld [vmem:[#allocation5 + $0x4a0] ss:$16 sps:$4 sm:$0xff]  }
  0x82   :  { %1681 = vmatprep.subr.bf16.mxu0 %v2437_v35  ;;  %1853 = vmatprep.subr.bf16.mxu1 %v2440_v36  ;;  %v2527_v35 = vld [vmem:[#allocation5 + $0x4c4] ss:$16 sps:$4 sm:$0xff]   ;;  %v2530_v36 = vld [vmem:[#allocation5 + $0x4cc] ss:$16 sps:$4 sm:$0xff]  }
  0x85   :  { %1682 = vmatpush1.bf16.msra.mxu0 %v2435_v37  ;;  %1854 = vmatpush1.bf16.msra.mxu1 %v2438_v38  ;;  %v2525_v37 = vld [vmem:[#allocation5 + $0x4c0] ss:$16 sps:$4 sm:$0xff]   ;;  %v2528_v38 = vld [vmem:[#allocation5 + $0x4c8] ss:$16 sps:$4 sm:$0xff]  }
  0x86   :  { %1683 = vmatprep.subr.bf16.mxu0 %v2443_v39  ;;  %1855 = vmatprep.subr.bf16.mxu1 %v2446_v40  ;;  %v2533_v39 = vld [vmem:[#allocation5 + $0x4e4] ss:$16 sps:$4 sm:$0xff]   ;;  %v2536_v40 = vld [vmem:[#allocation5 + $0x4ec] ss:$16 sps:$4 sm:$0xff]  }
  0x89   :  { %1684 = vmatpush1.bf16.msra.mxu0 %v2441_v41  ;;  %1856 = vmatpush1.bf16.msra.mxu1 %v2444_v42  ;;  %v2531_v41 = vld [vmem:[#allocation5 + $0x4e0] ss:$16 sps:$4 sm:$0xff]   ;;  %v2534_v42 = vld [vmem:[#allocation5 + $0x4e8] ss:$16 sps:$4 sm:$0xff]  }
  0x8a   :  { %1685 = vmatprep.subr.bf16.mxu0 %v2449_v43  ;;  %1857 = vmatprep.subr.bf16.mxu1 %v2452_v44  ;;  %v2539_v43 = vld [vmem:[#allocation5 + $0x504] ss:$16 sps:$4 sm:$0xff]   ;;  %v2542_v44 = vld [vmem:[#allocation5 + $0x50c] ss:$16 sps:$4 sm:$0xff]  }
  0x8d   :  { %1686 = vmatpush1.bf16.msra.mxu0 %v2447_v45  ;;  %1858 = vmatpush1.bf16.msra.mxu1 %v2450_v46  ;;  %v2537_v45 = vld [vmem:[#allocation5 + $0x500] ss:$16 sps:$4 sm:$0xff]   ;;  %v2540_v46 = vld [vmem:[#allocation5 + $0x508] ss:$16 sps:$4 sm:$0xff]  }
  0x8e   :  { %1687 = vmatprep.subr.bf16.mxu0 %v2455_v47  ;;  %1859 = vmatprep.subr.bf16.mxu1 %v2458_v48  ;;  %v2545_v47 = vld [vmem:[#allocation5 + $0x524] ss:$16 sps:$4 sm:$0xff]   ;;  %v2548_v48 = vld [vmem:[#allocation5 + $0x52c] ss:$16 sps:$4 sm:$0xff]  }
  0x91   :  { %1688 = vmatpush1.bf16.msra.mxu0 %v2453_v49  ;;  %1860 = vmatpush1.bf16.msra.mxu1 %v2456_v50  ;;  %v2543_v49 = vld [vmem:[#allocation5 + $0x520] ss:$16 sps:$4 sm:$0xff]   ;;  %v2546_v50 = vld [vmem:[#allocation5 + $0x528] ss:$16 sps:$4 sm:$0xff]  }
  0x92   :  { %1689 = vmatprep.subr.bf16.mxu0 %v2461_v51  ;;  %1861 = vmatprep.subr.bf16.mxu1 %v2464_v52  ;;  %v2551_v51 = vld [vmem:[#allocation5 + $0x544] ss:$16 sps:$4 sm:$0xff]   ;;  %v2554_v52 = vld [vmem:[#allocation5 + $0x54c] ss:$16 sps:$4 sm:$0xff]  }
  0x95   :  { %1690 = vmatpush1.bf16.msra.mxu0 %v2459_v53  ;;  %1862 = vmatpush1.bf16.msra.mxu1 %v2462_v54  ;;  %v2549_v53 = vld [vmem:[#allocation5 + $0x540] ss:$16 sps:$4 sm:$0xff]   ;;  %v2552_v54 = vld [vmem:[#allocation5 + $0x548] ss:$16 sps:$4 sm:$0xff]  }
  0x96   :  { %1691 = vmatprep.subr.bf16.mxu0 %v2467_v55  ;;  %1863 = vmatprep.subr.bf16.mxu1 %v2470_v56  ;;  %v2557_v55 = vld [vmem:[#allocation5 + $0x564] ss:$16 sps:$4 sm:$0xff]   ;;  %v2560_v56 = vld [vmem:[#allocation5 + $0x56c] ss:$16 sps:$4 sm:$0xff]  }
  0x99   :  { %1692 = vmatpush1.bf16.msra.mxu0 %v2465_v57  ;;  %1864 = vmatpush1.bf16.msra.mxu1 %v2468_v58  ;;  %v2555_v57 = vld [vmem:[#allocation5 + $0x560] ss:$16 sps:$4 sm:$0xff]   ;;  %v2558_v58 = vld [vmem:[#allocation5 + $0x568] ss:$16 sps:$4 sm:$0xff]  }
  0x9a   :  { %1693 = vmatprep.subr.bf16.mxu0 %v2473_v59  ;;  %1865 = vmatprep.subr.bf16.mxu1 %v2476_v60  ;;  %v2563_v59 = vld [vmem:[#allocation5 + $0x584] ss:$16 sps:$4 sm:$0xff]   ;;  %v2566_v60 = vld [vmem:[#allocation5 + $0x58c] ss:$16 sps:$4 sm:$0xff]  }
  0x9d   :  { %1694 = vmatpush1.bf16.msra.mxu0 %v2471_v61  ;;  %1866 = vmatpush1.bf16.msra.mxu1 %v2474_v62  ;;  %v2561_v61 = vld [vmem:[#allocation5 + $0x580] ss:$16 sps:$4 sm:$0xff]   ;;  %v2564_v62 = vld [vmem:[#allocation5 + $0x588] ss:$16 sps:$4 sm:$0xff]  }
  0x9e   :  { %1695 = vmatprep.subr.bf16.mxu0 %v2479_v63  ;;  %1867 = vmatprep.subr.bf16.mxu1 %v2482_v0  ;;  %v2569_v63 = vld [vmem:[#allocation5 + $0x5a4] ss:$16 sps:$4 sm:$0xff]   ;;  %v2572_v0 = vld [vmem:[#allocation5 + $0x5ac] ss:$16 sps:$4 sm:$0xff]  }
  0xa1   :  { %1696 = vmatpush1.bf16.msra.mxu0 %v2477_v1  ;;  %1868 = vmatpush1.bf16.msra.mxu1 %v2480_v2  ;;  %v2567_v1 = vld [vmem:[#allocation5 + $0x5a0] ss:$16 sps:$4 sm:$0xff]   ;;  %v2570_v2 = vld [vmem:[#allocation5 + $0x5a8] ss:$16 sps:$4 sm:$0xff]  }
  0xa2   :  { %1697 = vmatprep.subr.bf16.mxu0 %v2485_v3  ;;  %1869 = vmatprep.subr.bf16.mxu1 %v2488_v4  ;;  %v2575_v3 = vld [vmem:[#allocation5 + $0x5c4] ss:$16 sps:$4 sm:$0xff]   ;;  %v2578_v4 = vld [vmem:[#allocation5 + $0x5cc] ss:$16 sps:$4 sm:$0xff]  }
  0xa5   :  { %1698 = vmatpush1.bf16.msra.mxu0 %v2483_v5  ;;  %1870 = vmatpush1.bf16.msra.mxu1 %v2486_v6  ;;  %v2573_v5 = vld [vmem:[#allocation5 + $0x5c0] ss:$16 sps:$4 sm:$0xff]   ;;  %v2576_v6 = vld [vmem:[#allocation5 + $0x5c8] ss:$16 sps:$4 sm:$0xff]  }
  0xa6   :  { %1710 = vmatprep.subr.bf16.mxu0 %v2491_v7  ;;  %1882 = vmatprep.subr.bf16.mxu1 %v2494_v8  ;;  %v2581_v7 = vld [vmem:[#allocation5 + $0x5e4] ss:$16 sps:$4 sm:$0xff]   ;;  %v2584_v8 = vld [vmem:[#allocation5 + $0x5ec] ss:$16 sps:$4 sm:$0xff]  }
  0xa8   :  { %1700 = vmatmul.mubr.bf16.vlgmr.msra.gmra.mrb[0].mxu0 %v2004_v9  ;;  %1872 = vmatmul.mubr.bf16.vlgmr.msra.gmra.mrb[0].mxu1 %v2004_v9  ;;  %v2579_v9 = vld [vmem:[#allocation5 + $0x5e0] ss:$16 sps:$4 sm:$0xff]  }
  0xa9   :  { %1711 = vmatpush1.bf16.msra.mxu0 %v2489_v10  ;;  %1883 = vmatpush1.bf16.msra.mxu1 %v2492_v11  ;;  %v2582_v10 = vld [vmem:[#allocation5 + $0x5e8] ss:$16 sps:$4 sm:$0xff]   ;;  %v2587_v11 = vld [vmem:[#allocation5 + $0x604] ss:$16 sps:$4 sm:$0xff]  }
  0xaa   :  { %1712 = vmatprep.subr.bf16.mxu0 %v2497_v12  ;;  %1884 = vmatprep.subr.bf16.mxu1 %v2500_v13  ;;  %v2590_v12 = vld [vmem:[#allocation5 + $0x60c] ss:$16 sps:$4 sm:$0xff]   ;;  %v2006_v13 = vcombine.low %v2826_v14, %v2828_v15  ;;  %v2591_v14 = vld [vmem:[#allocation5 + $0x620] ss:$16 sps:$4 sm:$0xff]   ;;  %v2594_v15 = vld [vmem:[#allocation5 + $0x628] ss:$16 sps:$4 sm:$0xff]  }
  0xab   :  { %1742 = vmatprep.mubr.bf16.mxu0 %v2007_v16  ;;  %1914 = vmatprep.mubr.bf16.mxu1 %v2007_v16  ;;  %v2834_v16 = vld [vmem:[#allocation2 + $0x18] sm:$0xff] }
  0xad   :  { %1713 = vmatpush1.bf16.msra.mxu0 %v2495_v17  ;;  %1885 = vmatpush1.bf16.msra.mxu1 %v2498_v18  ;;  %v2836_v17 = vld [vmem:[#allocation2 + $0x38] sm:$0xff]  ;;  %v2585_v18 = vld [vmem:[#allocation5 + $0x600] ss:$16 sps:$4 sm:$0xff]  }
  0xae   :  { %1714 = vmatprep.subr.bf16.mxu0 %v2503_v19  ;;  %1886 = vmatprep.subr.bf16.mxu1 %v2506_v20  ;;  %v2588_v19 = vld [vmem:[#allocation5 + $0x608] ss:$16 sps:$4 sm:$0xff]   ;;  %v2593_v20 = vld [vmem:[#allocation5 + $0x624] ss:$16 sps:$4 sm:$0xff]  }
  0xb1   :  { %1715 = vmatpush1.bf16.msra.mxu0 %v2501_v21  ;;  %1887 = vmatpush1.bf16.msra.mxu1 %v2504_v22  ;;  %v2596_v21 = vld [vmem:[#allocation5 + $0x62c] ss:$16 sps:$4 sm:$0xff]   ;;  %v2009_v22 = vcombine.high %v2834_v16, %v2836_v17 }
  0xb2   :  { %1716 = vmatprep.subr.bf16.mxu0 %v2509_v23  ;;  %1888 = vmatprep.subr.bf16.mxu1 %v2512_v24  ;;  %v2599_v23 = vld [vmem:[#allocation5 + $0x644] ss:$16 sps:$4 sm:$0xff]   ;;  %v2602_v24 = vld [vmem:[#allocation5 + $0x64c] ss:$16 sps:$4 sm:$0xff]  }
  0xb5   :  { %1717 = vmatpush1.bf16.msra.mxu0 %v2507_v25  ;;  %1889 = vmatpush1.bf16.msra.mxu1 %v2510_v26  ;;  %v2597_v25 = vld [vmem:[#allocation5 + $0x640] ss:$16 sps:$4 sm:$0xff]   ;;  %v2600_v26 = vld [vmem:[#allocation5 + $0x648] ss:$16 sps:$4 sm:$0xff]  }
  0xb6   :  { %1718 = vmatprep.subr.bf16.mxu0 %v2515_v27  ;;  %1890 = vmatprep.subr.bf16.mxu1 %v2518_v28  ;;  %v2605_v27 = vld [vmem:[#allocation5 + $0x664] ss:$16 sps:$4 sm:$0xff]   ;;  %v2608_v28 = vld [vmem:[#allocation5 + $0x66c] ss:$16 sps:$4 sm:$0xff]  }
  0xb9   :  { %1719 = vmatpush1.bf16.msra.mxu0 %v2513_v29  ;;  %1891 = vmatpush1.bf16.msra.mxu1 %v2516_v30  ;;  %v2603_v29 = vld [vmem:[#allocation5 + $0x660] ss:$16 sps:$4 sm:$0xff]   ;;  %v2606_v30 = vld [vmem:[#allocation5 + $0x668] ss:$16 sps:$4 sm:$0xff]  }
  0xba   :  { %1720 = vmatprep.subr.bf16.mxu0 %v2521_v31  ;;  %1892 = vmatprep.subr.bf16.mxu1 %v2524_v32  ;;  %v2611_v31 = vld [vmem:[#allocation5 + $0x684] ss:$16 sps:$4 sm:$0xff]   ;;  %v2614_v32 = vld [vmem:[#allocation5 + $0x68c] ss:$16 sps:$4 sm:$0xff]  }
  0xbd   :  { %1721 = vmatpush1.bf16.msra.mxu0 %v2519_v33  ;;  %1893 = vmatpush1.bf16.msra.mxu1 %v2522_v34  ;;  %v2609_v33 = vld [vmem:[#allocation5 + $0x680] ss:$16 sps:$4 sm:$0xff]   ;;  %v2612_v34 = vld [vmem:[#allocation5 + $0x688] ss:$16 sps:$4 sm:$0xff]  }
  0xbe   :  { %1722 = vmatprep.subr.bf16.mxu0 %v2527_v35  ;;  %1894 = vmatprep.subr.bf16.mxu1 %v2530_v36  ;;  %v2617_v35 = vld [vmem:[#allocation5 + $0x6a4] ss:$16 sps:$4 sm:$0xff]   ;;  %v2620_v36 = vld [vmem:[#allocation5 + $0x6ac] ss:$16 sps:$4 sm:$0xff]  }
  0xc1   :  { %1723 = vmatpush1.bf16.msra.mxu0 %v2525_v37  ;;  %1895 = vmatpush1.bf16.msra.mxu1 %v2528_v38  ;;  %v2615_v37 = vld [vmem:[#allocation5 + $0x6a0] ss:$16 sps:$4 sm:$0xff]   ;;  %v2618_v38 = vld [vmem:[#allocation5 + $0x6a8] ss:$16 sps:$4 sm:$0xff]  }
  0xc2   :  { %1724 = vmatprep.subr.bf16.mxu0 %v2533_v39  ;;  %1896 = vmatprep.subr.bf16.mxu1 %v2536_v40  ;;  %v2623_v39 = vld [vmem:[#allocation5 + $0x6c4] ss:$16 sps:$4 sm:$0xff]   ;;  %v2626_v40 = vld [vmem:[#allocation5 + $0x6cc] ss:$16 sps:$4 sm:$0xff]  }
  0xc5   :  { %1725 = vmatpush1.bf16.msra.mxu0 %v2531_v41  ;;  %1897 = vmatpush1.bf16.msra.mxu1 %v2534_v42  ;;  %v2621_v41 = vld [vmem:[#allocation5 + $0x6c0] ss:$16 sps:$4 sm:$0xff]   ;;  %v2624_v42 = vld [vmem:[#allocation5 + $0x6c8] ss:$16 sps:$4 sm:$0xff]  }
  0xc6   :  { %1726 = vmatprep.subr.bf16.mxu0 %v2539_v43  ;;  %1898 = vmatprep.subr.bf16.mxu1 %v2542_v44  ;;  %v2629_v43 = vld [vmem:[#allocation5 + $0x6e4] ss:$16 sps:$4 sm:$0xff]   ;;  %v2632_v44 = vld [vmem:[#allocation5 + $0x6ec] ss:$16 sps:$4 sm:$0xff]  }
  0xc9   :  { %1727 = vmatpush1.bf16.msra.mxu0 %v2537_v45  ;;  %1899 = vmatpush1.bf16.msra.mxu1 %v2540_v46  ;;  %v2627_v45 = vld [vmem:[#allocation5 + $0x6e0] ss:$16 sps:$4 sm:$0xff]   ;;  %v2630_v46 = vld [vmem:[#allocation5 + $0x6e8] ss:$16 sps:$4 sm:$0xff]  }
  0xca   :  { %1728 = vmatprep.subr.bf16.mxu0 %v2545_v47  ;;  %1900 = vmatprep.subr.bf16.mxu1 %v2548_v48  ;;  %v2635_v47 = vld [vmem:[#allocation5 + $0x704] ss:$16 sps:$4 sm:$0xff]   ;;  %v2638_v48 = vld [vmem:[#allocation5 + $0x70c] ss:$16 sps:$4 sm:$0xff]  }
  0xcd   :  { %1729 = vmatpush1.bf16.msra.mxu0 %v2543_v49  ;;  %1901 = vmatpush1.bf16.msra.mxu1 %v2546_v50  ;;  %v2633_v49 = vld [vmem:[#allocation5 + $0x700] ss:$16 sps:$4 sm:$0xff]   ;;  %v2636_v50 = vld [vmem:[#allocation5 + $0x708] ss:$16 sps:$4 sm:$0xff]  }
  0xce   :  { %1730 = vmatprep.subr.bf16.mxu0 %v2551_v51  ;;  %1902 = vmatprep.subr.bf16.mxu1 %v2554_v52  ;;  %v2641_v51 = vld [vmem:[#allocation5 + $0x724] ss:$16 sps:$4 sm:$0xff]   ;;  %v2644_v52 = vld [vmem:[#allocation5 + $0x72c] ss:$16 sps:$4 sm:$0xff]  }
  0xd1   :  { %1731 = vmatpush1.bf16.msra.mxu0 %v2549_v53  ;;  %1903 = vmatpush1.bf16.msra.mxu1 %v2552_v54  ;;  %v2639_v53 = vld [vmem:[#allocation5 + $0x720] ss:$16 sps:$4 sm:$0xff]   ;;  %v2642_v54 = vld [vmem:[#allocation5 + $0x728] ss:$16 sps:$4 sm:$0xff]  }
  0xd2   :  { %1732 = vmatprep.subr.bf16.mxu0 %v2557_v55  ;;  %1904 = vmatprep.subr.bf16.mxu1 %v2560_v56  ;;  %v2647_v55 = vld [vmem:[#allocation5 + $0x744] ss:$16 sps:$4 sm:$0xff]   ;;  %v2650_v56 = vld [vmem:[#allocation5 + $0x74c] ss:$16 sps:$4 sm:$0xff]  }
  0xd5   :  { %1733 = vmatpush1.bf16.msra.mxu0 %v2555_v57  ;;  %1905 = vmatpush1.bf16.msra.mxu1 %v2558_v58  ;;  %v2645_v57 = vld [vmem:[#allocation5 + $0x740] ss:$16 sps:$4 sm:$0xff]   ;;  %v2648_v58 = vld [vmem:[#allocation5 + $0x748] ss:$16 sps:$4 sm:$0xff]  }
  0xd6   :  { %1734 = vmatprep.subr.bf16.mxu0 %v2563_v59  ;;  %1906 = vmatprep.subr.bf16.mxu1 %v2566_v60  ;;  %v2653_v59 = vld [vmem:[#allocation5 + $0x764] ss:$16 sps:$4 sm:$0xff]   ;;  %v2656_v60 = vld [vmem:[#allocation5 + $0x76c] ss:$16 sps:$4 sm:$0xff]  }
  0xd9   :  { %1735 = vmatpush1.bf16.msra.mxu0 %v2561_v61  ;;  %1907 = vmatpush1.bf16.msra.mxu1 %v2564_v62  ;;  %v2651_v61 = vld [vmem:[#allocation5 + $0x760] ss:$16 sps:$4 sm:$0xff]   ;;  %v2654_v62 = vld [vmem:[#allocation5 + $0x768] ss:$16 sps:$4 sm:$0xff]  }
  0xda   :  { %1736 = vmatprep.subr.bf16.mxu0 %v2569_v63  ;;  %1908 = vmatprep.subr.bf16.mxu1 %v2572_v0  ;;  %v2659_v63 = vld [vmem:[#allocation5 + $0x784] ss:$16 sps:$4 sm:$0xff]   ;;  %v2662_v0 = vld [vmem:[#allocation5 + $0x78c] ss:$16 sps:$4 sm:$0xff]  }
  0xdd   :  { %1737 = vmatpush1.bf16.msra.mxu0 %v2567_v1  ;;  %1909 = vmatpush1.bf16.msra.mxu1 %v2570_v2  ;;  %v2657_v1 = vld [vmem:[#allocation5 + $0x780] ss:$16 sps:$4 sm:$0xff]   ;;  %v2660_v2 = vld [vmem:[#allocation5 + $0x788] ss:$16 sps:$4 sm:$0xff]  }
  0xde   :  { %1738 = vmatprep.subr.bf16.mxu0 %v2575_v3  ;;  %1910 = vmatprep.subr.bf16.mxu1 %v2578_v4  ;;  %v2665_v3 = vld [vmem:[#allocation5 + $0x7a4] ss:$16 sps:$4 sm:$0xff]   ;;  %v2668_v4 = vld [vmem:[#allocation5 + $0x7ac] ss:$16 sps:$4 sm:$0xff]  }
  0xe1   :  { %1739 = vmatpush1.bf16.msra.mxu0 %v2573_v5  ;;  %1911 = vmatpush1.bf16.msra.mxu1 %v2576_v6  ;;  %v2663_v5 = vld [vmem:[#allocation5 + $0x7a0] ss:$16 sps:$4 sm:$0xff]   ;;  %v2666_v6 = vld [vmem:[#allocation5 + $0x7a8] ss:$16 sps:$4 sm:$0xff]  }
  0xe2   :  { %1740 = vmatprep.subr.bf16.mxu0 %v2581_v7  ;;  %1912 = vmatprep.subr.bf16.mxu1 %v2584_v8  ;;  %v2671_v7 = vld [vmem:[#allocation5 + $0x7c4] ss:$16 sps:$4 sm:$0xff]   ;;  %v2674_v8 = vld [vmem:[#allocation5 + $0x7cc] ss:$16 sps:$4 sm:$0xff]  }
  0xe5   :  { %1741 = vmatpush1.bf16.msra.mxu0 %v2579_v9  ;;  %1913 = vmatpush1.bf16.msra.mxu1 %v2582_v10  ;;  %v2669_v9 = vld [vmem:[#allocation5 + $0x7c0] ss:$16 sps:$4 sm:$0xff]   ;;  %v2672_v10 = vld [vmem:[#allocation5 + $0x7c8] ss:$16 sps:$4 sm:$0xff]  }
  0xe6   :  { %1753 = vmatprep.subr.bf16.mxu0 %v2587_v11  ;;  %1925 = vmatprep.subr.bf16.mxu1 %v2590_v12  ;;  %v2677_v11 = vld [vmem:[#allocation5 + $0x7e4] ss:$16 sps:$4 sm:$0xff]   ;;  %v2680_v12 = vld [vmem:[#allocation5 + $0x7ec] ss:$16 sps:$4 sm:$0xff]  }
  0xe8   :  { %1743 = vmatmul.mubr.bf16.vlgmr.msra.gmra.mrb[0].mxu0 %v2006_v13  ;;  %1915 = vmatmul.mubr.bf16.vlgmr.msra.gmra.mrb[0].mxu1 %v2006_v13  ;;  %v2675_v13 = vld [vmem:[#allocation5 + $0x7e0] ss:$16 sps:$4 sm:$0xff]  }
  0xe9   :  { %1754 = vmatpush1.bf16.msra.mxu0 %v2585_v18  ;;  %1926 = vmatpush1.bf16.msra.mxu1 %v2588_v19  ;;  %v2678_v18 = vld [vmem:[#allocation5 + $0x7e8] ss:$16 sps:$4 sm:$0xff]   ;;  %v2008_v19 = vcombine.low %v2834_v16, %v2836_v17 }
  0xea   :  { %1755 = vmatprep.subr.bf16.mxu0 %v2593_v20  ;;  %1927 = vmatprep.subr.bf16.mxu1 %v2596_v21 }
  0xeb   :  { %1785 = vmatprep.mubr.bf16.mxu0 %v2009_v22  ;;  %1957 = vmatprep.mubr.bf16.mxu1 %v2009_v22 }
  0xed   :  { %1756 = vmatpush1.bf16.msra.mxu0 %v2591_v14  ;;  %1928 = vmatpush1.bf16.msra.mxu1 %v2594_v15 }
  0xee   :  { %1757 = vmatprep.subr.bf16.mxu0 %v2599_v23  ;;  %1929 = vmatprep.subr.bf16.mxu1 %v2602_v24 }
  0xf1   :  { %1758 = vmatpush1.bf16.msra.mxu0 %v2597_v25  ;;  %1930 = vmatpush1.bf16.msra.mxu1 %v2600_v26 }
  0xf2   :  { %1759 = vmatprep.subr.bf16.mxu0 %v2605_v27  ;;  %1931 = vmatprep.subr.bf16.mxu1 %v2608_v28 }
  0xf5   :  { %1760 = vmatpush1.bf16.msra.mxu0 %v2603_v29  ;;  %1932 = vmatpush1.bf16.msra.mxu1 %v2606_v30 }
  0xf6   :  { %1761 = vmatprep.subr.bf16.mxu0 %v2611_v31  ;;  %1933 = vmatprep.subr.bf16.mxu1 %v2614_v32 }
  0xf9   :  { %1762 = vmatpush1.bf16.msra.mxu0 %v2609_v33  ;;  %1934 = vmatpush1.bf16.msra.mxu1 %v2612_v34 }
  0xfa   :  { %1763 = vmatprep.subr.bf16.mxu0 %v2617_v35  ;;  %1935 = vmatprep.subr.bf16.mxu1 %v2620_v36 }
  0xfd   :  { %1764 = vmatpush1.bf16.msra.mxu0 %v2615_v37  ;;  %1936 = vmatpush1.bf16.msra.mxu1 %v2618_v38 }
  0xfe   :  { %1765 = vmatprep.subr.bf16.mxu0 %v2623_v39  ;;  %1937 = vmatprep.subr.bf16.mxu1 %v2626_v40 }
 0x101   :  { %1766 = vmatpush1.bf16.msra.mxu0 %v2621_v41  ;;  %1938 = vmatpush1.bf16.msra.mxu1 %v2624_v42 }
 0x102   :  { %1767 = vmatprep.subr.bf16.mxu0 %v2629_v43  ;;  %1939 = vmatprep.subr.bf16.mxu1 %v2632_v44 }
 0x105   :  { %1768 = vmatpush1.bf16.msra.mxu0 %v2627_v45  ;;  %1940 = vmatpush1.bf16.msra.mxu1 %v2630_v46 }
 0x106   :  { %1769 = vmatprep.subr.bf16.mxu0 %v2635_v47  ;;  %1941 = vmatprep.subr.bf16.mxu1 %v2638_v48 }
 0x109   :  { %1770 = vmatpush1.bf16.msra.mxu0 %v2633_v49  ;;  %1942 = vmatpush1.bf16.msra.mxu1 %v2636_v50 }
 0x10a   :  { %1771 = vmatprep.subr.bf16.mxu0 %v2641_v51  ;;  %1943 = vmatprep.subr.bf16.mxu1 %v2644_v52 }
 0x10d   :  { %1772 = vmatpush1.bf16.msra.mxu0 %v2639_v53  ;;  %1944 = vmatpush1.bf16.msra.mxu1 %v2642_v54 }
 0x10e   :  { %1773 = vmatprep.subr.bf16.mxu0 %v2647_v55  ;;  %1945 = vmatprep.subr.bf16.mxu1 %v2650_v56 }
 0x111   :  { %1774 = vmatpush1.bf16.msra.mxu0 %v2645_v57  ;;  %1946 = vmatpush1.bf16.msra.mxu1 %v2648_v58 }
 0x112   :  { %1775 = vmatprep.subr.bf16.mxu0 %v2653_v59  ;;  %1947 = vmatprep.subr.bf16.mxu1 %v2656_v60 }
 0x115   :  { %1776 = vmatpush1.bf16.msra.mxu0 %v2651_v61  ;;  %1948 = vmatpush1.bf16.msra.mxu1 %v2654_v62 }
 0x116   :  { %1777 = vmatprep.subr.bf16.mxu0 %v2659_v63  ;;  %1949 = vmatprep.subr.bf16.mxu1 %v2662_v0 }
 0x119   :  { %1778 = vmatpush1.bf16.msra.mxu0 %v2657_v1  ;;  %1950 = vmatpush1.bf16.msra.mxu1 %v2660_v2 }
 0x11a   :  { %1779 = vmatprep.subr.bf16.mxu0 %v2665_v3  ;;  %1951 = vmatprep.subr.bf16.mxu1 %v2668_v4 }
 0x11d   :  { %1780 = vmatpush1.bf16.msra.mxu0 %v2663_v5  ;;  %1952 = vmatpush1.bf16.msra.mxu1 %v2666_v6 }
 0x11e   :  { %1781 = vmatprep.subr.bf16.mxu0 %v2671_v7  ;;  %1953 = vmatprep.subr.bf16.mxu1 %v2674_v8 }
 0x121   :  { %1782 = vmatpush1.bf16.msra.mxu0 %v2669_v9  ;;  %1954 = vmatpush1.bf16.msra.mxu1 %v2672_v10 }
 0x122   :  { %1783 = vmatprep.subr.bf16.mxu0 %v2677_v11  ;;  %1955 = vmatprep.subr.bf16.mxu1 %v2680_v12 }
 0x125   :  { %1784 = vmatpush1.bf16.msra.mxu0 %v2675_v13  ;;  %1956 = vmatpush1.bf16.msra.mxu1 %v2678_v18 }
 0x128   :  { %1786 = vmatmul.mubr.bf16.vlgmr.msra.gmra.mrb[0].mxu0 %v2008_v19  ;;  %1958 = vmatmul.mubr.bf16.vlgmr.msra.gmra.mrb[0].mxu1 %v2008_v19 }
 0x1fb   :  { %v1787_v20 = vpop.f32.mrb[0].mxu0  ;;  %v1959_v21 = vpop.f32.mrb[0].mxu1 }
 0x1fc   :  { %2681 = vtanh.f32 %v1787_v20  ;;  %v1789_v22 = vpop.f32.mrb[1].mxu0  ;;  %v1961_v14 = vpop.f32.mrb[1].mxu1 }
 0x1fd   :  { %2683 = vtanh.f32 %v1959_v21  ;;  %v1791_v15 = vpop.f32.mrb[2].mxu0  ;;  %v1963_v23 = vpop.f32.mrb[2].mxu1 }
 0x1fe   :  { %2685 = vtanh.f32 %v1789_v22  ;;  %v1793_v24 = vpop.f32.mrb[3].mxu0  ;;  %v1965_v25 = vpop.f32.mrb[3].mxu1 }
 0x1ff   :  { %2687 = vtanh.f32 %v1961_v14 }
 0x200   :  { %2689 = vtanh.f32 %v1791_v15 }
 0x201   :  { %2691 = vtanh.f32 %v1963_v23 }
 0x202   :  { %2693 = vtanh.f32 %v1793_v24 }
 0x203   :  { %2695 = vtanh.f32 %v1965_v25 }
 0x206   :  { %v2682_v16 = vpop.eup %2681 }
 0x207   :  { %v2684_v17 = vpop.eup %2683  ;;  %1976 = vst [vmem:[#allocation7] sm:$0xff] %v2682_v16 }
 0x208   :  { %v2686_v26 = vpop.eup %2685  ;;  %1978 = vst [vmem:[#allocation7 + $0x10] sm:$0xff] %v2684_v17 }
 0x209   :  { %v2688_v27 = vpop.eup %2687  ;;  %1977 = vst [vmem:[#allocation7 + $0x8] sm:$0xff] %v2686_v26 }
 0x20a   :  { %v2690_v28 = vpop.eup %2689  ;;  %1979 = vst [vmem:[#allocation7 + $0x18] sm:$0xff] %v2688_v27 }
 0x20b   :  { %v2692_v29 = vpop.eup %2691  ;;  %1980 = vst [vmem:[#allocation7 + $0x20] sm:$0xff] %v2690_v28 }
 0x20c   :  { %v2694_v30 = vpop.eup %2693  ;;  %1982 = vst [vmem:[#allocation7 + $0x30] sm:$0xff] %v2692_v29 }
 0x20d   :  { %v2696_v31 = vpop.eup %2695  ;;  %1981 = vst [vmem:[#allocation7 + $0x28] sm:$0xff] %v2694_v30 }
 0x20e   :  { %1983 = vst [vmem:[#allocation7 + $0x38] sm:$0xff] %v2696_v31 }
 0x20f   :  { %2752 = shalt.err (!%p2749_p6)
}
 0x210   :  { %s2753_s12 = scalar_lea.hbm %s2859_s2, 1024 }
 0x211   :  { %p2754_p7 = scmp.ne.s32.totalorder %s2859_s2, %s2753_s12  ;;  %p2757_p8 = scmp.lt.u32.totalorder %s2753_s12, %s2859_s2 }
 0x213   :  { %p2759_p9 = pnand %p2757_p8, %p2754_p7 }
 0x215   :  { %2762 = shalt.err (!%p2759_p9)
}
 0x216   :  { %1995 = dma.vmem_to_hbm [thread:$0]  %s1990_s8, 1024, %s2859_s2, [#allocation4], %s2770_s19, %s2770_s19, %s2771_s20  }
 0x217   :  { %2767 = dma.done.wait [#allocation4], 1024  }
 0x218   :  { %2768 = vsyncadd [#allocation4], 4294966272 }
 0x219   :  { %1999 = vsyncpa [#allocation3], 1 }
 0x21a   :  { %2000 = vsyncpa [#allocation6], 1 }
 0x21b   :  { %2001 = vsyncpa [#allocation4], 1 }

</bundles_post_ra>
